<compile_context>
chip_gen: v6e
topology: v6e:2x2x1
jax: 0.10.0
libtpu: 0.0.40
codegen_flags: <defaults>
</compile_context>

<pallas_src>
import functools
import math

import jax
import jax.numpy as jnp
from jax import lax
from jax.experimental import pallas as pl
from jax.experimental.pallas import tpu as pltpu


def _running_min_argmin(get_row, n_rows):
    """Fused single-pass running min value + argmin over `n_rows` rows.

    NaN-propagating and first-occurrence tie-breaking, matching torch.min.
    `get_row(r)` must return the r-th row as a 2-D (rows, lanes) array.
    """
    vmin = get_row(0)
    imin = jnp.zeros(vmin.shape, dtype=jnp.int32)
    for r in range(1, n_rows):            # static, tiny trip count -> unrolled
        v = get_row(r)
        keep_old = (vmin <= v) | jnp.isnan(vmin)
        vmin = jnp.where(keep_old, vmin, v)
        imin = jnp.where(keep_old, imin, jnp.int32(r))
    return vmin, imin


def _min_kernel(x_ref, y_ref, z_ref, w_ref, slab_ref, ymin_ref, *, batch, channels):
    """Gridless single-step kernel computing every torch.min variant.

    x_ref   : (B*C, N)      x flattened batch-major (free reshape in wrapper)
    y_ref   : (A0, A1*A2)   flattened y
    z_ref   : (Z0, M)       z flattened, M = Z1*Z2*Z3 (lane-dense)
    w_ref   : (Z0, M)       w flattened
    slab_ref: (Z0+2+2B, M)  merged output slab:
                rows [0, Z0)            : minimum(z, w)
                row  Z0                 : min(z, dim=0)
                row  Z0+1               : bitcast(int32 argmin(z, dim=0))
                rows [Z0+2, Z0+2+B)     : min(x, dim=1)     in lanes [0, N)
                rows [Z0+2+B, Z0+2+2B)  : bitcast argmin(x) in lanes [0, N)
    ymin_ref: (1, 1) SMEM   global scalar min of y
    """
    B, C = batch, channels
    Z0, M = z_ref.shape
    N = x_ref.shape[1]

    # ---- torch.min(z, w) and torch.min(z, dim=0, keepdim=True) --------------
    # All stores below are full-width (M = 256 lanes) -> unmasked vst.
    z = z_ref[...]
    w = w_ref[...]
    slab_ref[0:Z0, :] = jnp.minimum(z, w)
    zvmin, zidx = _running_min_argmin(lambda r: z[r:r + 1, :], Z0)
    slab_ref[Z0:Z0 + 1, :] = zvmin
    slab_ref[Z0 + 1:Z0 + 2, :] = pltpu.bitcast(zidx, jnp.float32)

    # ---- torch.min(x, dim=1): fused value + argmin, one pass per batch row --
    x = x_ref[...]                                         # (B*C, N)
    for b in range(B):                                     # static, tiny B
        blk = x[b * C:(b + 1) * C, :]                      # (C, N)
        xvmin, xidx = _running_min_argmin(lambda r: blk[r:r + 1, :], C)
        slab_ref[Z0 + 2 + b:Z0 + 3 + b, 0:N] = xvmin
        slab_ref[Z0 + 2 + B + b:Z0 + 3 + B + b, 0:N] = pltpu.bitcast(xidx, jnp.float32)

    # ---- torch.min(y): global scalar min -> SMEM -----------------------------
    ymin_ref[0, 0] = jnp.min(y_ref[...])


@jax.jit
def torch_min_model(x, y, z, w):
    """Pallas equivalent of Model.forward. Returns (x, x_idx, y, z, z_idx, w)."""
    B, C, N = x.shape
    Z0 = z.shape[0]
    M = math.prod(z.shape[1:])
    z_keep = (1,) + z.shape[1:]

    # TODO(synk): int32-as-float32 bit-packing of the argmin indices assumes
    # 32-bit float values; other dtypes would need a separate int32 output.
    assert x.dtype == jnp.float32 and z.dtype == jnp.float32

    # Wrapper layout plumbing: every reshape below is contiguous (no-copy
    # bitcast); the old transpose of x has been moved into the kernel.
    x2 = x.reshape(B * C, N)
    y2 = y.reshape(y.shape[0], -1)
    zf = z.reshape(Z0, M)
    wf = w.reshape(Z0, M)

    vmem = pl.BlockSpec(memory_space=pltpu.MemorySpace.VMEM)
    smem = pl.BlockSpec(memory_space=pltpu.MemorySpace.SMEM)

    slab, ymin = pl.pallas_call(
        functools.partial(_min_kernel, batch=B, channels=C),
        out_shape=(
            jax.ShapeDtypeStruct((Z0 + 2 + 2 * B, M), z.dtype),   # merged slab
            jax.ShapeDtypeStruct((1, 1), y.dtype),                # scalar y min
        ),
        in_specs=[vmem, vmem, vmem, vmem],
        out_specs=(vmem, smem),
    )(x2, y2, zf, wf)

    wmin = slab[:Z0].reshape(z.shape)
    zmin = slab[Z0:Z0 + 1].reshape(z_keep)
    zidx = lax.bitcast_convert_type(slab[Z0 + 1:Z0 + 2], jnp.int32).reshape(z_keep)
    xmin = slab[Z0 + 2:Z0 + 2 + B, :N]
    xidx = lax.bitcast_convert_type(slab[Z0 + 2 + B:Z0 + 2 + 2 * B, :N], jnp.int32)
    return xmin, xidx, ymin.reshape(()), zmin, zidx, wmin


if __name__ == "__main__":
    key = jax.random.PRNGKey(0)
    kx, ky, kz, kw = jax.random.split(key, 4)

    x = jax.random.normal(kx, (2, 4, 16), dtype=jnp.float32)
    y = jax.random.normal(ky, (3, 5, 8), dtype=jnp.float32)
    z = jax.random.normal(kz, (4, 2, 8, 16), dtype=jnp.float32)
    w = jax.random.normal(kw, (4, 2, 8, 16), dtype=jnp.float32)

    out = jax.block_until_ready(torch_min_model(x, y, z, w))
    xmin, xidx, ymin, zmin, zidx, wmin = out

    # Reference check against plain-JAX semantics (same as torch.min).
    assert jnp.allclose(xmin, jnp.min(x, axis=1))
    assert jnp.array_equal(xidx, jnp.argmin(x, axis=1).astype(jnp.int32))
    assert jnp.allclose(ymin, jnp.min(y))
    assert jnp.allclose(zmin, jnp.min(z, axis=0, keepdims=True))
    assert jnp.array_equal(zidx, jnp.argmin(z, axis=0, keepdims=True).astype(jnp.int32))
    assert jnp.allclose(wmin, jnp.minimum(z, w))

    print("KERNEL_OK")
</pallas_src>

<mosaic_0001>
module attributes {stable_mosaic.version = 11 : i64} {
  func.func @_min_kernel(%arg0: memref<8x16xf32, #tpu.memory_space<vmem>>, %arg1: memref<3x40xf32, #tpu.memory_space<vmem>>, %arg2: memref<4x256xf32, #tpu.memory_space<vmem>>, %arg3: memref<4x256xf32, #tpu.memory_space<vmem>>, %arg4: memref<10x256xf32, #tpu.memory_space<vmem>>, %arg5: memref<1x1xf32, #tpu.memory_space<smem>>) attributes {dimension_semantics = [], scalar_prefetch = 0 : i64, scratch_operands = 0 : i64, tpu.core_type = #tpu.core_type<tc>} {
    %c0 = arith.constant 0 : index
    %c0_0 = arith.constant 0 : index
    %0 = vector.load %arg2[%c0, %c0_0] : memref<4x256xf32, #tpu.memory_space<vmem>>, vector<4x256xf32>
    %c0_1 = arith.constant 0 : index
    %c0_2 = arith.constant 0 : index
    %1 = vector.load %arg3[%c0_1, %c0_2] : memref<4x256xf32, #tpu.memory_space<vmem>>, vector<4x256xf32>
    %2 = arith.minimumf %0, %1 : vector<4x256xf32>
    %c0_3 = arith.constant 0 : index
    %c0_4 = arith.constant 0 : index
    %3 = vector.load %arg4[%c0_3, %c0_4] : memref<10x256xf32, #tpu.memory_space<vmem>>, vector<4x256xf32>
    tpu.vector_store %arg4[%c0_3, %c0_4], %2 {strides = array<i32>} : memref<10x256xf32, #tpu.memory_space<vmem>>, vector<4x256xf32>,
    %4 = vector.extract_strided_slice %0 {offsets = [0, 0], sizes = [1, 256], strides = [1, 1]} : vector<4x256xf32> to vector<1x256xf32>
    %c0_i32 = arith.constant 0 : i32
    %5 = vector.broadcast %c0_i32 : i32 to vector<1x256xi32>
    %6 = vector.extract_strided_slice %0 {offsets = [1, 0], sizes = [1, 256], strides = [1, 1]} : vector<4x256xf32> to vector<1x256xf32>
    %7 = arith.cmpf ole, %4, %6 : vector<1x256xf32>
    %8 = arith.cmpf one, %4, %4 : vector<1x256xf32>
    %9 = arith.ori %7, %8 : vector<1x256xi1>
    %10 = arith.select %9, %4, %6 : vector<1x256xi1>, vector<1x256xf32>
    %c1_i32 = arith.constant 1 : i32
    %11 = vector.broadcast %c1_i32 : i32 to vector<1x256xi32>
    %12 = arith.select %9, %5, %11 : vector<1x256xi1>, vector<1x256xi32>
    %13 = vector.extract_strided_slice %0 {offsets = [2, 0], sizes = [1, 256], strides = [1, 1]} : vector<4x256xf32> to vector<1x256xf32>
    %14 = arith.cmpf ole, %10, %13 : vector<1x256xf32>
    %15 = arith.cmpf one, %10, %10 : vector<1x256xf32>
    %16 = arith.ori %14, %15 : vector<1x256xi1>
    %17 = arith.select %16, %10, %13 : vector<1x256xi1>, vector<1x256xf32>
    %c2_i32 = arith.constant 2 : i32
    %18 = vector.broadcast %c2_i32 : i32 to vector<1x256xi32>
    %19 = arith.select %16, %12, %18 : vector<1x256xi1>, vector<1x256xi32>
    %20 = vector.extract_strided_slice %0 {offsets = [3, 0], sizes = [1, 256], strides = [1, 1]} : vector<4x256xf32> to vector<1x256xf32>
    %21 = arith.cmpf ole, %17, %20 : vector<1x256xf32>
    %22 = arith.cmpf one, %17, %17 : vector<1x256xf32>
    %23 = arith.ori %21, %22 : vector<1x256xi1>
    %24 = arith.select %23, %17, %20 : vector<1x256xi1>, vector<1x256xf32>
    %c3_i32 = arith.constant 3 : i32
    %25 = vector.broadcast %c3_i32 : i32 to vector<1x256xi32>
    %26 = arith.select %23, %19, %25 : vector<1x256xi1>, vector<1x256xi32>
    %c4 = arith.constant 4 : index
    %c0_5 = arith.constant 0 : index
    %27 = vector.load %arg4[%c4, %c0_5] : memref<10x256xf32, #tpu.memory_space<vmem>>, vector<1x256xf32>
    tpu.vector_store %arg4[%c4, %c0_5], %24 {strides = array<i32>} : memref<10x256xf32, #tpu.memory_space<vmem>>, vector<1x256xf32>,
    %28 = tpu.bitcast %26 : vector<1x256xi32> -> vector<1x256xf32>
    %c5 = arith.constant 5 : index
    %c0_6 = arith.constant 0 : index
    %29 = vector.load %arg4[%c5, %c0_6] : memref<10x256xf32, #tpu.memory_space<vmem>>, vector<1x256xf32>
    tpu.vector_store %arg4[%c5, %c0_6], %28 {strides = array<i32>} : memref<10x256xf32, #tpu.memory_space<vmem>>, vector<1x256xf32>,
    %c0_7 = arith.constant 0 : index
    %c0_8 = arith.constant 0 : index
    %30 = vector.load %arg0[%c0_7, %c0_8] : memref<8x16xf32, #tpu.memory_space<vmem>>, vector<8x16xf32>
    %31 = vector.extract_strided_slice %30 {offsets = [0, 0], sizes = [4, 16], strides = [1, 1]} : vector<8x16xf32> to vector<4x16xf32>
    %32 = vector.extract_strided_slice %31 {offsets = [0, 0], sizes = [1, 16], strides = [1, 1]} : vector<4x16xf32> to vector<1x16xf32>
    %c0_i32_9 = arith.constant 0 : i32
    %33 = vector.broadcast %c0_i32_9 : i32 to vector<1x16xi32>
    %34 = vector.extract_strided_slice %31 {offsets = [1, 0], sizes = [1, 16], strides = [1, 1]} : vector<4x16xf32> to vector<1x16xf32>
    %35 = arith.cmpf ole, %32, %34 : vector<1x16xf32>
    %36 = arith.cmpf one, %32, %32 : vector<1x16xf32>
    %37 = arith.ori %35, %36 : vector<1x16xi1>
    %38 = arith.select %37, %32, %34 : vector<1x16xi1>, vector<1x16xf32>
    %c1_i32_10 = arith.constant 1 : i32
    %39 = vector.broadcast %c1_i32_10 : i32 to vector<1x16xi32>
    %40 = arith.select %37, %33, %39 : vector<1x16xi1>, vector<1x16xi32>
    %41 = vector.extract_strided_slice %31 {offsets = [2, 0], sizes = [1, 16], strides = [1, 1]} : vector<4x16xf32> to vector<1x16xf32>
    %42 = arith.cmpf ole, %38, %41 : vector<1x16xf32>
    %43 = arith.cmpf one, %38, %38 : vector<1x16xf32>
    %44 = arith.ori %42, %43 : vector<1x16xi1>
    %45 = arith.select %44, %38, %41 : vector<1x16xi1>, vector<1x16xf32>
    %c2_i32_11 = arith.constant 2 : i32
    %46 = vector.broadcast %c2_i32_11 : i32 to vector<1x16xi32>
    %47 = arith.select %44, %40, %46 : vector<1x16xi1>, vector<1x16xi32>
    %48 = vector.extract_strided_slice %31 {offsets = [3, 0], sizes = [1, 16], strides = [1, 1]} : vector<4x16xf32> to vector<1x16xf32>
    %49 = arith.cmpf ole, %45, %48 : vector<1x16xf32>
    %50 = arith.cmpf one, %45, %45 : vector<1x16xf32>
    %51 = arith.ori %49, %50 : vector<1x16xi1>
    %52 = arith.select %51, %45, %48 : vector<1x16xi1>, vector<1x16xf32>
    %c3_i32_12 = arith.constant 3 : i32
    %53 = vector.broadcast %c3_i32_12 : i32 to vector<1x16xi32>
    %54 = arith.select %51, %47, %53 : vector<1x16xi1>, vector<1x16xi32>
    %c6 = arith.constant 6 : index
    %c0_13 = arith.constant 0 : index
    %55 = vector.load %arg4[%c6, %c0_13] : memref<10x256xf32, #tpu.memory_space<vmem>>, vector<1x16xf32>
    tpu.vector_store %arg4[%c6, %c0_13], %52 {strides = array<i32>} : memref<10x256xf32, #tpu.memory_space<vmem>>, vector<1x16xf32>,
    %56 = tpu.bitcast %54 : vector<1x16xi32> -> vector<1x16xf32>
    %c8 = arith.constant 8 : index
    %c0_14 = arith.constant 0 : index
    %57 = vector.load %arg4[%c8, %c0_14] : memref<10x256xf32, #tpu.memory_space<vmem>>, vector<1x16xf32>
    tpu.vector_store %arg4[%c8, %c0_14], %56 {strides = array<i32>} : memref<10x256xf32, #tpu.memory_space<vmem>>, vector<1x16xf32>,
    %58 = vector.extract_strided_slice %30 {offsets = [4, 0], sizes = [4, 16], strides = [1, 1]} : vector<8x16xf32> to vector<4x16xf32>
    %59 = vector.extract_strided_slice %58 {offsets = [0, 0], sizes = [1, 16], strides = [1, 1]} : vector<4x16xf32> to vector<1x16xf32>
    %c0_i32_15 = arith.constant 0 : i32
    %60 = vector.broadcast %c0_i32_15 : i32 to vector<1x16xi32>
    %61 = vector.extract_strided_slice %58 {offsets = [1, 0], sizes = [1, 16], strides = [1, 1]} : vector<4x16xf32> to vector<1x16xf32>
    %62 = arith.cmpf ole, %59, %61 : vector<1x16xf32>
    %63 = arith.cmpf one, %59, %59 : vector<1x16xf32>
    %64 = arith.ori %62, %63 : vector<1x16xi1>
    %65 = arith.select %64, %59, %61 : vector<1x16xi1>, vector<1x16xf32>
    %c1_i32_16 = arith.constant 1 : i32
    %66 = vector.broadcast %c1_i32_16 : i32 to vector<1x16xi32>
    %67 = arith.select %64, %60, %66 : vector<1x16xi1>, vector<1x16xi32>
    %68 = vector.extract_strided_slice %58 {offsets = [2, 0], sizes = [1, 16], strides = [1, 1]} : vector<4x16xf32> to vector<1x16xf32>
    %69 = arith.cmpf ole, %65, %68 : vector<1x16xf32>
    %70 = arith.cmpf one, %65, %65 : vector<1x16xf32>
    %71 = arith.ori %69, %70 : vector<1x16xi1>
    %72 = arith.select %71, %65, %68 : vector<1x16xi1>, vector<1x16xf32>
    %c2_i32_17 = arith.constant 2 : i32
    %73 = vector.broadcast %c2_i32_17 : i32 to vector<1x16xi32>
    %74 = arith.select %71, %67, %73 : vector<1x16xi1>, vector<1x16xi32>
    %75 = vector.extract_strided_slice %58 {offsets = [3, 0], sizes = [1, 16], strides = [1, 1]} : vector<4x16xf32> to vector<1x16xf32>
    %76 = arith.cmpf ole, %72, %75 : vector<1x16xf32>
    %77 = arith.cmpf one, %72, %72 : vector<1x16xf32>
    %78 = arith.ori %76, %77 : vector<1x16xi1>
    %79 = arith.select %78, %72, %75 : vector<1x16xi1>, vector<1x16xf32>
    %c3_i32_18 = arith.constant 3 : i32
    %80 = vector.broadcast %c3_i32_18 : i32 to vector<1x16xi32>
    %81 = arith.select %78, %74, %80 : vector<1x16xi1>, vector<1x16xi32>
    %c7 = arith.constant 7 : index
    %c0_19 = arith.constant 0 : index
    %82 = vector.load %arg4[%c7, %c0_19] : memref<10x256xf32, #tpu.memory_space<vmem>>, vector<1x16xf32>
    tpu.vector_store %arg4[%c7, %c0_19], %79 {strides = array<i32>} : memref<10x256xf32, #tpu.memory_space<vmem>>, vector<1x16xf32>,
    %83 = tpu.bitcast %81 : vector<1x16xi32> -> vector<1x16xf32>
    %c9 = arith.constant 9 : index
    %c0_20 = arith.constant 0 : index
    %84 = vector.load %arg4[%c9, %c0_20] : memref<10x256xf32, #tpu.memory_space<vmem>>, vector<1x16xf32>
    tpu.vector_store %arg4[%c9, %c0_20], %83 {strides = array<i32>} : memref<10x256xf32, #tpu.memory_space<vmem>>, vector<1x16xf32>,
    %c0_21 = arith.constant 0 : index
    %c0_22 = arith.constant 0 : index
    %85 = vector.load %arg1[%c0_21, %c0_22] : memref<3x40xf32, #tpu.memory_space<vmem>>, vector<3x40xf32>
    %86 = vector.shape_cast %85 : vector<3x40xf32> to vector<1x3x40xf32>
    %cst = arith.constant dense<0x7F800000> : vector<1xf32>
    %87 = vector.multi_reduction <minimumf>, %86, %cst [1, 2] : vector<1x3x40xf32> to vector<1xf32>
    %88 = vector.shape_cast %87 : vector<1xf32> to vector<1x1x1xf32>
    %89 = vector.extract %88[0, 0, 0] : f32 from vector<1x1x1xf32>
    %c0_23 = arith.constant 0 : index
    %c0_24 = arith.constant 0 : index
    %90 = memref.load %arg5[%c0_23, %c0_24] : memref<1x1xf32, #tpu.memory_space<smem>>
    memref.store %89, %arg5[%c0_23, %c0_24] : memref<1x1xf32, #tpu.memory_space<smem>>
    return
  }
}

</mosaic_0001>

<bundles_post_ra>
// kernel: torch_min_model.1
= control target key start
LH: loop header
LB: loop body
LE: loop exit
PB: predicated region body
PF: predicated region fallthrough
CT: control target
= control target key end

     0   :  { %v57_v2 = vlaneseq  ;;  %s278_s0 = inlined_call_operand.vmem [shape: f32[8,16], index: 0, kind: input, shape index: {}]   ;;  %s279_s1 = inlined_call_operand.vmem [shape: f32[3,40], index: 1, kind: input, shape index: {}]   ;;  %s280_s2 = inlined_call_operand.vmem [shape: f32[4,256], index: 2, kind: input, shape index: {}]   ;;  %s281_s3 = inlined_call_operand.vmem [shape: f32[4,256], index: 3, kind: input, shape index: {}]   ;;  %s282_s4 = inlined_call_operand.vmem [shape: f32[10,256], index: 4, kind: output, shape index: {0}]   ;;  %s283_s5 = inlined_call_operand.hbm [shape: f32[1,1], index: 5, kind: output, shape index: {1}]  }
   0x1   :  { %v20_v0 = vld [vmem:[%s280_s2] sm:$0xff] }
   0x2   :  { %v21_v1 = vld [vmem:[%s281_s3] sm:$0xff]  ;;  %v29_v5 = vrot.slane %v20_v0, 5  ;;  %v37_v6 = vrot.slane %v20_v0, 6 }
   0x3   :  { %v103_v3 = vld [vmem:[%s278_s0] sm:$0xff]  ;;  %v22_v4 = vmin.f32 %v20_v0, %v21_v1 }
   0x4   :  { %11 = vsyncpa [#allocation3], 0  ;;  %vm33_vm0 = vcmp.ne.f32.partialorder %v20_v0, %v20_v0  ;;  %v185_v7 = vmov 1966171168   ;;  %v30_v10 = vrot.slane %v29_v5, 4  ;;  %v45_v11 = vrot.slane %v20_v0, 7 }
   0x5   :  { %v55_v8 = vunpack.c.l.s4 %v185_v7  ;;  %v24_v9 = vcombine.high %v22_v4, %v22_v4  ;;  %26 = vst [vmem:[%s282_s4] sm:$0xf] %v22_v4  ;;  %v105_v12 = vrot.slane %v103_v3, 1  ;;  %v38_v13 = vrot.slane %v37_v6, 4  ;;  %v137_v15 = vld [vmem:[%s279_s1] sm:$0x7]  ;;  %s187_s14 = smov [#allocation2]  }
   0x6   :  { %v58_v14 = vshrl.u32 %v57_v2, 7  ;;  %vm32_vm1 = vcmp.le.f32.partialorder %v20_v0, %v30_v10  ;;  %vm108_vm3 = vcmp.ne.f32.partialorder %v103_v3, %v103_v3  ;;  %v112_v16 = vrot.slane %v103_v3, 2 }
   0x7   :  { %27 = vst [vmem:[%s282_s4 + $0x8] sm:$0xf] %v24_v9  ;;  %vm107_vm2 = vcmp.le.f32.partialorder %v103_v3, %v105_v12  ;;  %vm34_vm4 = vmor %vm32_vm1, %vm33_vm0  ;;  %v56_v17 = vunpack.c.0.s8 %v55_v8  ;;  %vm138_vm5 = vcmask 321536   ;;  %v186_v19 = vmov 1  }
   0x8   :  { %v35_v18 = vsel %vm34_vm4, %v20_v0, %v30_v10  ;;  %v36_v20 = vsel %vm34_vm4, 0, %v186_v19  ;;  %v46_v21 = vrot.slane %v45_v11, 4  ;;  %vm109_vm6 = vmor %vm107_vm2, %vm108_vm3  ;;  %v139_v22 = vsel %vm138_vm5, %v137_v15, inf }
   0x9   :  { %vm40_vm7 = vcmp.le.f32.partialorder %v35_v18, %v38_v13  ;;  %vm41_vm8 = vcmp.ne.f32.partialorder %v35_v18, %v35_v18  ;;  %v110_v23 = vsel %vm109_vm6, %v103_v3, %v105_v12  ;;  %v119_v24 = vrot.slane %v103_v3, 3  ;;  %140 = vmin.xlane.f32.xlu0 %v139_v22 }
   0xa   :  { %vm237_vm9 = vmor %vm40_vm7, %vm41_vm8  ;;  %v78_v26 = vsub.s32 0, %v58_v14  ;;  %v111_v27 = vsel %vm109_vm6, 0, %v186_v19  ;;  %vm114_vm10 = vcmp.le.f32.partialorder %v110_v23, %v112_v16  ;;  %vm115_vm11 = vcmp.ne.f32.partialorder %v110_v23, %v110_v23 }
   0xb   :  { %v43_v28 = vsel %vm237_vm9, %v35_v18, %v38_v13  ;;  %v44_v29 = vsel %vm237_vm9, %v36_v20, 2  ;;  %v59_v30 = vsub.s32 %v56_v17, %v58_v14  ;;  %v82_v31 = vsub.s32 4, %v58_v14  ;;  %vm245_vm12 = vmor %vm114_vm10, %vm115_vm11 }
   0xc   :  { %vm48_vm13 = vcmp.le.f32.partialorder %v43_v28, %v46_v21  ;;  %vm49_vm14 = vcmp.ne.f32.partialorder %v43_v28, %v43_v28  ;;  %v117_v33 = vsel %vm245_vm12, %v110_v23, %v112_v16  ;;  %v118_v34 = vsel %vm245_vm12, %v111_v27, 2 }
   0xd   :  { %vm50_vm15 = vmor %vm48_vm13, %vm49_vm14  ;;  %vm121_vm0 = vcmp.le.f32.partialorder %v117_v33, %v119_v24  ;;  %vm122_vm1 = vcmp.ne.f32.partialorder %v117_v33, %v117_v33  ;;  %vm126_vm2 = vcmask 122880   ;;  %vm71_vm4 = vcmp.lt.s32.totalorder %v57_v2, 256 }
   0xe   :  { %v51_v35 = vsel %vm50_vm15, %v43_v28, %v46_v21  ;;  %v52_v36 = vsel %vm50_vm15, %v44_v29, 3  ;;  %vm123_vm3 = vmor %vm121_vm0, %vm122_vm1 }
   0xf   :  { %v60_v37 = vrot.slane %v51_v35, %v59_v30  ;;  %v79_v38 = vrot.slane %v52_v36, %v78_v26  ;;  %v83_v39 = vrot.slane %v52_v36, %v82_v31  ;;  %v124_v40 = vsel %vm123_vm3, %v117_v33, %v119_v24 }
  0x10   :  { %v125_v41 = vsel %vm123_vm3, %v118_v34, 3  ;;  %127 = vst.msk [vmem:[%s282_s4 + $0x6] sm:$0x1] %vm126_vm2, %v124_v40  ;;  %v131_v42 = vrot.slane %v124_v40, 4 }
  0x11   :  { %v67_v43 = vrot.slane %v60_v37, %v59_v30  ;;  %v84_v44 = vcombine.low %v79_v38, %v83_v39  ;;  %129 = vst.msk [vmem:[%s282_s4 + $0x10] sm:$0x1] %vm126_vm2, %v125_v41  ;;  %v134_v45 = vrot.slane %v125_v41, 4 }
  0x12   :  { %133 = vst.msk [vmem:[%s282_s4 + $0x7] sm:$0x1] %vm126_vm2, %v131_v42 }
  0x13   :  { %168 = vst.msk [vmem:[%s282_s4 + $0x4] ss:$8 sm:$0x3] %vm71_vm4, %v67_v43  ;;  %v91_v46 = vrot.slane %v84_v44, %v59_v30 }
  0x14   :  { %136 = vst.msk [vmem:[%s282_s4 + $0x11] sm:$0x1] %vm126_vm2, %v134_v45 }
  0x15   :  { %v98_v47 = vrot.slane %v91_v46, %v59_v30 }
  0x17   :  { %169 = vst.msk [vmem:[%s282_s4 + $0x5] ss:$8 sm:$0x3] %vm71_vm4, %v98_v47 }
  0x92   :  { %v141_v48 = vpop.xlane.xlu0 %140 }
  0x93   :  { %v142_v49 = vrot.slane %v141_v48, 4 }
  0x95   :  { %v143_v50 = vmin.f32 %v141_v48, %v142_v49 }
  0x97   :  { %v144_v51 = vrot.slane %v143_v50, 2 }
  0x99   :  { %v145_v52 = vmin.f32 %v143_v50, %v144_v51 }
  0x9b   :  { %v146_v53 = vrot.slane %v145_v52, 1 }
  0x9d   :  { %v147_v54 = vmin.f32 %v145_v52, %v146_v53 }
  0x9f   :  { %170 = vpush %v147_v54 }
  0xd0   :  { %s171_s13 = spop %170 }
  0xd1   :  { %150 = sst [smem:[#allocation2]] %s171_s13 }
  0xd2   :  { %160 = dma.smem_to_hbm %s187_s14, 16, %s283_s5, [#allocation3]  }
  0xd3   :  { %183 = dma.done.wait [#allocation3], 16  }
  0xd4   :  { %184 = vsyncadd [#allocation3], 4294967280 }
  0xd5   :  { %166 = sfence }
  0xd6   :  { %167 = vsyncpa [#allocation3], 1 }

</bundles_post_ra>
